<compile_context>
chip_gen: v7x
topology: tpu7x:2x2x1
jax: 0.10.0
libtpu: 0.0.40
codegen_flags: <defaults>
</compile_context>

<pallas_src>
import jax
import jax.numpy as jnp
from jax import lax
from jax.experimental import pallas as pl
from jax.experimental.pallas import tpu as pltpu

LN_EPS = 1e-5                       # nn.LayerNorm default
VMEM_LIMIT_BYTES = 32 * 1024 * 1024  # explicit (v5e default is only 16 MiB)


# ---------------------------------------------------------------------------
# Shared per-step math: (pre-LN gates (B,4H) f32, c (B,H) f32) -> (h', c') f32
# ---------------------------------------------------------------------------
def _gates_to_state(gates, c, gamma, beta):
    H = c.shape[-1]

    # Centered two-pass LayerNorm (numerical parity with nn.LayerNorm).
    mean = jnp.mean(gates, axis=-1, keepdims=True)
    centered = gates - mean
    var = jnp.mean(centered * centered, axis=-1, keepdims=True)
    gates = centered * lax.rsqrt(var + LN_EPS) * gamma + beta

    # One full-width tanh covers all four gates (single EUP push / element):
    #   sigmoid(x) = 0.5 * (tanh(0.5 * x) + 1); the cell gate uses tanh itself.
    lane = lax.broadcasted_iota(jnp.int32, gates.shape, gates.ndim - 1)
    is_cell = (lane >= 2 * H) & (lane < 3 * H)
    t = jnp.tanh(jnp.where(is_cell, gates, 0.5 * gates))
    act = jnp.where(is_cell, t, 0.5 * t + 0.5)

    i_g = act[:, 0 * H:1 * H]
    f_g = act[:, 1 * H:2 * H]
    g_g = act[:, 2 * H:3 * H]
    o_g = act[:, 3 * H:4 * H]
    c_next = f_g * c + i_g * g_g
    h_next = o_g * jnp.tanh(c_next)
    return h_next, c_next


# ---------------------------------------------------------------------------
# Single-step cell (exactly the PyTorch module's forward).
# x and h are separate VMEM inputs (no wrapper-side concat / HBM temp).
# ---------------------------------------------------------------------------
def _lstm_cell_kernel(x_ref, h_ref, c_ref, wx_ref, wh_ref, b_ref,
                      gamma_ref, beta_ref, h_out_ref, c_out_ref):
    gates = (jnp.dot(x_ref[...].astype(wx_ref.dtype), wx_ref[...],
                     preferred_element_type=jnp.float32)
             + jnp.dot(h_ref[...].astype(wh_ref.dtype), wh_ref[...],
                       preferred_element_type=jnp.float32)
             + b_ref[...].astype(jnp.float32))
    h_next, c_next = _gates_to_state(
        gates,
        c_ref[...].astype(jnp.float32),
        gamma_ref[...].astype(jnp.float32),
        beta_ref[...].astype(jnp.float32))
    h_out_ref[...] = h_next.astype(h_out_ref.dtype)
    c_out_ref[...] = c_next.astype(c_out_ref.dtype)


def layernorm_lstm_cell(x, h, c, wx, wh, bias, gamma, beta):
    """x:(B,D) h,c:(B,H) wx:(D,4H) wh:(H,4H) bias/gamma/beta:(1,4H)."""
    B, H = c.shape
    vmem = pl.BlockSpec(memory_space=pltpu.VMEM)
    # TODO(synk): when driving this cell from an outer lax.scan, alias h/c via
    # input_output_aliases to avoid a per-step HBM round trip of the state.
    return pl.pallas_call(
        _lstm_cell_kernel,
        out_shape=(jax.ShapeDtypeStruct((B, H), h.dtype),
                   jax.ShapeDtypeStruct((B, H), c.dtype)),
        in_specs=[vmem] * 8,
        out_specs=(vmem, vmem),
        compiler_params=pltpu.CompilerParams(
            vmem_limit_bytes=VMEM_LIMIT_BYTES),
    )(x, h, c, wx, wh, bias, gamma, beta)


# ---------------------------------------------------------------------------
# Phase 1 (parallel): one big matmul off the serial path.
#   pre_gates[t, b] = x_seq[t, b] @ Wx + bias     (f32)
# ---------------------------------------------------------------------------
def _input_proj_kernel(x_ref, wx_ref, b_ref, out_ref):
    out_ref[...] = (jnp.dot(x_ref[...].astype(wx_ref.dtype), wx_ref[...],
                            preferred_element_type=jnp.float32)
                    + b_ref[...].astype(jnp.float32)).astype(out_ref.dtype)


def _input_projection(x_seq, wx, bias, *, tm=512):
    T, B, D = x_seq.shape
    G = wx.shape[-1]
    TB = T * B
    x_flat = x_seq.reshape(TB, D)
    tm = min(tm, TB)                       # tm == TB (full) or a multiple of 8
    grid = (pl.cdiv(TB, tm),)
    pre = pl.pallas_call(
        _input_proj_kernel,
        out_shape=jax.ShapeDtypeStruct((TB, G), jnp.float32),
        grid_spec=pltpu.PrefetchScalarGridSpec(
            num_scalar_prefetch=0,
            grid=grid,
            in_specs=[
                pl.BlockSpec((tm, D), lambda m: (m, 0)),
                pl.BlockSpec((D, G), lambda m: (0, 0)),
                pl.BlockSpec((1, G), lambda m: (0, 0)),
            ],
            out_specs=pl.BlockSpec((tm, G), lambda m: (m, 0)),
        ),
        compiler_params=pltpu.CompilerParams(
            dimension_semantics=("parallel",),
            vmem_limit_bytes=VMEM_LIMIT_BYTES),
    )(x_flat, wx, bias)
    return pre.reshape(T, B, G)


# ---------------------------------------------------------------------------
# Phase 2 (sequential): recurrence only.  Tb timesteps per grid iteration,
# Wh resident (single-buffered) in VMEM scratch, h/c carried in VMEM scratch.
# ---------------------------------------------------------------------------
def _lstm_seq_kernel(pg_ref, h0_ref, c0_ref, wh_hbm, gamma_ref, beta_ref,
                     hseq_ref, cfin_ref, wh_vmem, h_st, c_st, dma_sem):
    tb = pl.program_id(0)
    n_inner = hseq_ref.shape[0]            # Tb (static)

    @pl.when(tb == 0)
    def _():
        # Copy the grid-invariant weight HBM->VMEM once; it stays resident
        # (no double-buffering cost for an operand that never changes).
        cp = pltpu.make_async_copy(wh_hbm, wh_vmem, dma_sem)
        cp.start()
        cp.wait()
        h_st[...] = h0_ref[...].astype(jnp.float32)
        c_st[...] = c0_ref[...].astype(jnp.float32)

    # Hoisted out of the per-step loop.
    gamma = gamma_ref[...].astype(jnp.float32)
    beta = beta_ref[...].astype(jnp.float32)
    wh = wh_vmem[...]

    def step(i, carry):
        h_prev, c_prev = carry
        gates = pg_ref[i].astype(jnp.float32) + jnp.dot(
            h_prev.astype(wh.dtype), wh, preferred_element_type=jnp.float32)
        h_next, c_next = _gates_to_state(gates, c_prev, gamma, beta)
        hseq_ref[i] = h_next.astype(hseq_ref.dtype)
        return (h_next, c_next)

    h_fin, c_fin = lax.fori_loop(0, n_inner, step,
                                 (h_st[...], c_st[...]), unroll=True)
    h_st[...] = h_fin
    c_st[...] = c_fin
    cfin_ref[...] = c_fin.astype(cfin_ref.dtype)   # only final c goes to HBM


def _largest_divisor_leq(n, cap):
    cap = max(1, min(n, cap))
    for d in range(cap, 0, -1):
        if n % d == 0:
            return d
    return 1


def layernorm_lstm_sequence(x_seq, h0, c0, wx, wh, bias, gamma, beta,
                            *, steps_per_block=8):
    """x_seq:(T,B,D) h0,c0:(B,H) wx:(D,4H) wh:(H,4H) bias/gamma/beta:(1,4H).

    Returns (h_seq:(T,B,H), c_final:(B,H)).
    """
    T, B, _ = x_seq.shape
    H = h0.shape[-1]
    G = 4 * H

    # Phase 1: input projection as one MXU-saturating parallel matmul.
    pre_gates = _input_projection(x_seq, wx, bias)          # (T, B, 4H) f32

    # Phase 2: sequential recurrence, Tb steps per grid iteration.
    Tb = _largest_divisor_leq(T, steps_per_block)
    grid_spec = pltpu.PrefetchScalarGridSpec(
        num_scalar_prefetch=0,
        grid=(T // Tb,),
        in_specs=[
            pl.BlockSpec((Tb, B, G), lambda t: (t, 0, 0)),   # streamed pre-gates
            pl.BlockSpec((B, H), lambda t: (0, 0)),          # h0 (read at t==0)
            pl.BlockSpec((B, H), lambda t: (0, 0)),          # c0 (read at t==0)
            pl.BlockSpec(memory_space=pl.ANY),               # Wh: manual DMA once
            pl.BlockSpec((1, G), lambda t: (0, 0)),          # gamma
            pl.BlockSpec((1, G), lambda t: (0, 0)),          # beta
        ],
        out_specs=[
            pl.BlockSpec((Tb, B, H), lambda t: (t, 0, 0)),   # h_t, Tb at a time
            pl.BlockSpec((B, H), lambda t: (0, 0)),          # final c only
        ],
        scratch_shapes=[
            pltpu.VMEM((H, G), wh.dtype),       # resident single-buffered Wh
            pltpu.VMEM((B, H), jnp.float32),    # h carry
            pltpu.VMEM((B, H), jnp.float32),    # c carry
            pltpu.SemaphoreType.DMA,            # weight-load semaphore
        ],
    )
    h_seq, c_final = pl.pallas_call(
        _lstm_seq_kernel,
        out_shape=(jax.ShapeDtypeStruct((T, B, H), h0.dtype),
                   jax.ShapeDtypeStruct((B, H), c0.dtype)),
        grid_spec=grid_spec,
        compiler_params=pltpu.CompilerParams(
            dimension_semantics=("arbitrary",),   # recurrence is sequential
            vmem_limit_bytes=VMEM_LIMIT_BYTES),
    )(pre_gates, h0, c0, wh, gamma, beta)
    return h_seq, c_final


# ---------------------------------------------------------------------------
# Parameter init mimicking nn.Linear (uniform +-1/sqrt(fan_in)) and
# nn.LayerNorm (gamma=1, beta=0).  Weights stored transposed (in, out).
# ---------------------------------------------------------------------------
def init_params(key, input_dim, hidden_dim, dtype=jnp.float32):
    k1, k2, k3, k4 = jax.random.split(key, 4)
    G = 4 * hidden_dim
    bx_bound = 1.0 / (input_dim ** 0.5)
    bh_bound = 1.0 / (hidden_dim ** 0.5)
    wx = jax.random.uniform(k1, (input_dim, G), dtype, -bx_bound, bx_bound)
    wh = jax.random.uniform(k2, (hidden_dim, G), dtype, -bh_bound, bh_bound)
    bx = jax.random.uniform(k3, (1, G), dtype, -bx_bound, bx_bound)
    bh = jax.random.uniform(k4, (1, G), dtype, -bh_bound, bh_bound)
    bias = bx + bh     # the two Linear biases always appear summed in forward()
    gamma = jnp.ones((1, G), dtype)
    beta = jnp.zeros((1, G), dtype)
    return wx, wh, bias, gamma, beta


# ---------------------------------------------------------------------------
# Pure-JAX references.
# ---------------------------------------------------------------------------
def reference_step(x, h, c, wx, wh, bias, gamma, beta):
    gates = x @ wx + h @ wh + bias
    mean = gates.mean(-1, keepdims=True)
    var = ((gates - mean) ** 2).mean(-1, keepdims=True)
    gates = (gates - mean) / jnp.sqrt(var + LN_EPS) * gamma + beta
    H = h.shape[-1]
    i_g = jax.nn.sigmoid(gates[:, :H])
    f_g = jax.nn.sigmoid(gates[:, H:2 * H])
    g_g = jnp.tanh(gates[:, 2 * H:3 * H])
    o_g = jax.nn.sigmoid(gates[:, 3 * H:])
    c_next = f_g * c + i_g * g_g
    h_next = o_g * jnp.tanh(c_next)
    return h_next, c_next


def reference_sequence(x_seq, h0, c0, wx, wh, bias, gamma, beta):
    def step(carry, x_t):
        h, c = carry
        h2, c2 = reference_step(x_t, h, c, wx, wh, bias, gamma, beta)
        return (h2, c2), (h2, c2)
    _, (hs, cs) = lax.scan(step, (h0, c0), x_seq)
    return hs, cs


if __name__ == "__main__":
    # hidden_dim a multiple of 128 so gates/outputs are lane-dense.
    batch, input_dim, hidden_dim, seq_len = 8, 64, 128, 16

    key = jax.random.PRNGKey(0)
    kx, kh, kc, kp, ks = jax.random.split(key, 5)
    x = jax.random.normal(kx, (batch, input_dim), jnp.float32)
    h0 = jax.random.normal(kh, (batch, hidden_dim), jnp.float32)
    c0 = jax.random.normal(kc, (batch, hidden_dim), jnp.float32)
    wx, wh, bias, gamma, beta = init_params(kp, input_dim, hidden_dim)

    # --- single-step cell (the module's forward) ---------------------------
    h1, c1 = layernorm_lstm_cell(x, h0, c0, wx, wh, bias, gamma, beta)
    jax.block_until_ready((h1, c1))
    h_ref, c_ref = reference_step(x, h0, c0, wx, wh, bias, gamma, beta)
    assert jnp.allclose(h1, h_ref, atol=1e-4, rtol=1e-4)
    assert jnp.allclose(c1, c_ref, atol=1e-4, rtol=1e-4)

    # --- fused recurrence: parallel x@Wx phase + Tb-blocked serial phase ---
    x_seq = jax.random.normal(ks, (seq_len, batch, input_dim), jnp.float32)
    h_seq, c_fin = layernorm_lstm_sequence(x_seq, h0, c0, wx, wh,
                                           bias, gamma, beta)
    jax.block_until_ready((h_seq, c_fin))
    hs_ref, cs_ref = reference_sequence(x_seq, h0, c0, wx, wh, bias, gamma, beta)
    assert jnp.allclose(h_seq, hs_ref, atol=1e-4, rtol=1e-4)
    assert jnp.allclose(c_fin, cs_ref[-1], atol=1e-4, rtol=1e-4)

    # --- bf16 MXU operands (weights only); f32 carry & LN, loose tolerance --
    h_seq_bf, c_fin_bf = layernorm_lstm_sequence(
        x_seq, h0, c0, wx.astype(jnp.bfloat16), wh.astype(jnp.bfloat16),
        bias, gamma, beta)
    jax.block_until_ready((h_seq_bf, c_fin_bf))
    assert jnp.allclose(h_seq_bf.astype(jnp.float32), hs_ref,
                        atol=1e-1, rtol=1e-1)

    print("KERNEL_OK")
</pallas_src>

<mosaic_0001>
module attributes {stable_mosaic.version = 11 : i64} {
  func.func @_lstm_cell_kernel(%arg0: memref<8x64xf32, #tpu.memory_space<vmem>>, %arg1: memref<8x128xf32, #tpu.memory_space<vmem>>, %arg2: memref<8x128xf32, #tpu.memory_space<vmem>>, %arg3: memref<64x512xf32, #tpu.memory_space<vmem>>, %arg4: memref<128x512xf32, #tpu.memory_space<vmem>>, %arg5: memref<1x512xf32, #tpu.memory_space<vmem>>, %arg6: memref<1x512xf32, #tpu.memory_space<vmem>>, %arg7: memref<1x512xf32, #tpu.memory_space<vmem>>, %arg8: memref<8x128xf32, #tpu.memory_space<vmem>>, %arg9: memref<8x128xf32, #tpu.memory_space<vmem>>) attributes {dimension_semantics = [], scalar_prefetch = 0 : i64, scratch_operands = 0 : i64, tpu.core_type = #tpu.core_type<tc>} {
    %c0 = arith.constant 0 : index
    %c0_0 = arith.constant 0 : index
    %0 = vector.load %arg0[%c0, %c0_0] : memref<8x64xf32, #tpu.memory_space<vmem>>, vector<8x64xf32>
    %c0_1 = arith.constant 0 : index
    %c0_2 = arith.constant 0 : index
    %1 = vector.load %arg3[%c0_1, %c0_2] : memref<64x512xf32, #tpu.memory_space<vmem>>, vector<64x512xf32>
    %cst = arith.constant dense<0.000000e+00> : vector<8x512xf32>
    %2 = tpu.matmul %0, %1, %cst {dimension_numbers = #tpu.dot_dimension_numbers<[1], [0], [0], [1], [0, 0, 1, 1], [], []>} : vector<8x64xf32>, vector<64x512xf32>, vector<8x512xf32> -> vector<8x512xf32>
    %c0_3 = arith.constant 0 : index
    %c0_4 = arith.constant 0 : index
    %3 = vector.load %arg1[%c0_3, %c0_4] : memref<8x128xf32, #tpu.memory_space<vmem>>, vector<8x128xf32>
    %c0_5 = arith.constant 0 : index
    %c0_6 = arith.constant 0 : index
    %4 = vector.load %arg4[%c0_5, %c0_6] : memref<128x512xf32, #tpu.memory_space<vmem>>, vector<128x512xf32>
    %cst_7 = arith.constant dense<0.000000e+00> : vector<8x512xf32>
    %5 = tpu.matmul %3, %4, %cst_7 {dimension_numbers = #tpu.dot_dimension_numbers<[1], [0], [0], [1], [0, 0, 1, 1], [], []>} : vector<8x128xf32>, vector<128x512xf32>, vector<8x512xf32> -> vector<8x512xf32>
    %6 = arith.addf %2, %5 : vector<8x512xf32>
    %c0_8 = arith.constant 0 : index
    %c0_9 = arith.constant 0 : index
    %7 = vector.load %arg5[%c0_8, %c0_9] : memref<1x512xf32, #tpu.memory_space<vmem>>, vector<1x512xf32>
    %8 = vector.broadcast %7 : vector<1x512xf32> to vector<8x512xf32>
    %9 = arith.addf %6, %8 : vector<8x512xf32>
    %c0_10 = arith.constant 0 : index
    %c0_11 = arith.constant 0 : index
    %10 = vector.load %arg2[%c0_10, %c0_11] : memref<8x128xf32, #tpu.memory_space<vmem>>, vector<8x128xf32>
    %c0_12 = arith.constant 0 : index
    %c0_13 = arith.constant 0 : index
    %11 = vector.load %arg6[%c0_12, %c0_13] : memref<1x512xf32, #tpu.memory_space<vmem>>, vector<1x512xf32>
    %c0_14 = arith.constant 0 : index
    %c0_15 = arith.constant 0 : index
    %12 = vector.load %arg7[%c0_14, %c0_15] : memref<1x512xf32, #tpu.memory_space<vmem>>, vector<1x512xf32>
    %cst_16 = arith.constant dense<0.000000e+00> : vector<8xf32>
    %13 = vector.multi_reduction <add>, %9, %cst_16 [1] : vector<8x512xf32> to vector<8xf32>
    %14 = vector.shape_cast %13 : vector<8xf32> to vector<8x1xf32>
    %cst_17 = arith.constant 5.120000e+02 : f32
    %15 = vector.broadcast %cst_17 : f32 to vector<8x1xf32>
    %16 = arith.divf %14, %15 : vector<8x1xf32>
    %17 = vector.broadcast %16 : vector<8x1xf32> to vector<8x512xf32>
    %18 = arith.subf %9, %17 : vector<8x512xf32>
    %19 = arith.mulf %18, %18 : vector<8x512xf32>
    %cst_18 = arith.constant dense<0.000000e+00> : vector<8xf32>
    %20 = vector.multi_reduction <add>, %19, %cst_18 [1] : vector<8x512xf32> to vector<8xf32>
    %21 = vector.shape_cast %20 : vector<8xf32> to vector<8x1xf32>
    %cst_19 = arith.constant 5.120000e+02 : f32
    %22 = vector.broadcast %cst_19 : f32 to vector<8x1xf32>
    %23 = arith.divf %21, %22 : vector<8x1xf32>
    %cst_20 = arith.constant 9.99999974E-6 : f32
    %24 = vector.broadcast %cst_20 : f32 to vector<8x1xf32>
    %25 = arith.addf %23, %24 : vector<8x1xf32>
    %26 = math.rsqrt %25 : vector<8x1xf32>
    %27 = vector.broadcast %26 : vector<8x1xf32> to vector<8x512xf32>
    %28 = arith.mulf %18, %27 : vector<8x512xf32>
    %29 = vector.broadcast %11 : vector<1x512xf32> to vector<8x512xf32>
    %30 = arith.mulf %28, %29 : vector<8x512xf32>
    %31 = vector.broadcast %12 : vector<1x512xf32> to vector<8x512xf32>
    %32 = arith.addf %30, %31 : vector<8x512xf32>
    %33 = tpu.iota {dimensions = array<i32: 1>} : vector<8x512xi32>
    %c256_i32 = arith.constant 256 : i32
    %34 = vector.broadcast %c256_i32 : i32 to vector<8x512xi32>
    %35 = arith.cmpi sge, %33, %34 : vector<8x512xi32>
    %c384_i32 = arith.constant 384 : i32
    %36 = vector.broadcast %c384_i32 : i32 to vector<8x512xi32>
    %37 = arith.cmpi slt, %33, %36 : vector<8x512xi32>
    %38 = arith.andi %35, %37 : vector<8x512xi1>
    %cst_21 = arith.constant 5.000000e-01 : f32
    %39 = vector.broadcast %cst_21 : f32 to vector<8x512xf32>
    %40 = arith.mulf %39, %32 : vector<8x512xf32>
    %41 = arith.select %38, %32, %40 : vector<8x512xi1>, vector<8x512xf32>
    %42 = math.tanh %41 : vector<8x512xf32>
    %cst_22 = arith.constant 5.000000e-01 : f32
    %43 = vector.broadcast %cst_22 : f32 to vector<8x512xf32>
    %44 = arith.mulf %43, %42 : vector<8x512xf32>
    %cst_23 = arith.constant 5.000000e-01 : f32
    %45 = vector.broadcast %cst_23 : f32 to vector<8x512xf32>
    %46 = arith.addf %44, %45 : vector<8x512xf32>
    %47 = arith.select %38, %42, %46 : vector<8x512xi1>, vector<8x512xf32>
    %48 = vector.extract_strided_slice %47 {offsets = [0, 0], sizes = [8, 128], strides = [1, 1]} : vector<8x512xf32> to vector<8x128xf32>
    %49 = vector.extract_strided_slice %47 {offsets = [0, 128], sizes = [8, 128], strides = [1, 1]} : vector<8x512xf32> to vector<8x128xf32>
    %50 = vector.extract_strided_slice %47 {offsets = [0, 256], sizes = [8, 128], strides = [1, 1]} : vector<8x512xf32> to vector<8x128xf32>
    %51 = vector.extract_strided_slice %47 {offsets = [0, 384], sizes = [8, 128], strides = [1, 1]} : vector<8x512xf32> to vector<8x128xf32>
    %52 = arith.mulf %49, %10 : vector<8x128xf32>
    %53 = arith.mulf %48, %50 : vector<8x128xf32>
    %54 = arith.addf %52, %53 : vector<8x128xf32>
    %55 = math.tanh %54 : vector<8x128xf32>
    %56 = arith.mulf %51, %55 : vector<8x128xf32>
    %c0_24 = arith.constant 0 : index
    %c0_25 = arith.constant 0 : index
    %57 = vector.load %arg8[%c0_24, %c0_25] : memref<8x128xf32, #tpu.memory_space<vmem>>, vector<8x128xf32>
    tpu.vector_store %arg8[%c0_24, %c0_25], %56 {strides = array<i32>} : memref<8x128xf32, #tpu.memory_space<vmem>>, vector<8x128xf32>,
    %c0_26 = arith.constant 0 : index
    %c0_27 = arith.constant 0 : index
    %58 = vector.load %arg9[%c0_26, %c0_27] : memref<8x128xf32, #tpu.memory_space<vmem>>, vector<8x128xf32>
    tpu.vector_store %arg9[%c0_26, %c0_27], %54 {strides = array<i32>} : memref<8x128xf32, #tpu.memory_space<vmem>>, vector<8x128xf32>,
    return
  }
}

</mosaic_0001>

<bundles_post_ra>
// kernel: tpu_custom_call.1
= control target key start
LH: loop header
LB: loop body
LE: loop exit
PB: predicated region body
PF: predicated region fallthrough
CT: control target
= control target key end

     0   :  { %15 = vsyncpa [#allocation3], 0  ;;  %s1124_s0 = inlined_call_operand.hbm [shape: f32[8,64], index: 0, kind: input, shape index: {}]   ;;  %s1125_s1 = inlined_call_operand.hbm [shape: f32[8,128], index: 1, kind: input, shape index: {}]   ;;  %s1126_s2 = inlined_call_operand.hbm [shape: f32[8,128], index: 2, kind: input, shape index: {}]   ;;  %s1127_s3 = inlined_call_operand.hbm [shape: f32[64,512], index: 3, kind: input, shape index: {}]   ;;  %s1128_s4 = inlined_call_operand.hbm [shape: f32[128,512], index: 4, kind: input, shape index: {}]   ;;  %s1129_s5 = inlined_call_operand.vmem [shape: f32[1,512], index: 5, kind: input, shape index: {}]   ;;  %s1130_s6 = inlined_call_operand.vmem [shape: f32[1,512], index: 6, kind: input, shape index: {}]   ;;  %s1131_s7 = inlined_call_operand.vmem [shape: f32[1,512], index: 7, kind: input, shape index: {}]   ;;  %s1132_s8 = inlined_call_operand.hbm [shape: f32[8,128], index: 8, kind: output, shape index: {0}]   ;;  %s1133_s9 = inlined_call_operand.hbm [shape: f32[8,128], index: 9, kind: output, shape index: {1}]  }
   0x1   :  { %16 = vsyncpa [#allocation6], 0 }
   0x2   :  { %17 = vsyncpa [#allocation9], 0 }
   0x3   :  { %18 = vsyncpa [#allocation4], 0 }
   0x4   :  { %19 = vsyncpa [#allocation13], 0  ;;  %s954_s30 = smov [#allocation5]   ;;  %s955_s11 = smov [#allocation8]  }
   0x5   :  { %s36_s10 = sshll.u32 %s954_s30, 4  ;;  %s55_s12 = sshll.u32 %s955_s11, 4  ;;  %s37_s10 = int_to_ptr.vmem [resolvable:$true] %s36_s10  ;;  %s1014_s12 = int_to_ptr.vmem [resolvable:$true] %s55_s12 }
   0x6   :  { %s790_s15 = scalar_lea.hbm %s1125_s1, 128 }
   0x7   :  { %p791_p0 = scmp.ne.s32.totalorder %s1125_s1, %s790_s15  ;;  %p794_p1 = scmp.lt.u32.totalorder %s790_s15, %s1125_s1 }
   0x9   :  { %p796_p2 = pnand %p794_p1, %p791_p0 }
   0xb   :  { %799 = shalt.err (!%p796_p2)
}
   0xc   :  { %s800_s20 = scalar_lea.vmem %s37_s10, 128  ;;  %p805_p4 = scmp.lt.s32.totalorder %s37_s10, %s37_s10 }
   0xd   :  { %p801_p3 = scmp.ne.s32.totalorder %s37_s10, %s800_s20  ;;  %p806_p5 = scmp.lt.s32.totalorder %s800_s20, %s800_s20 }
   0xf   :  { %p807_p6 = por %p806_p5, %p805_p4 }
  0x11   :  { %p808_p7 = pnand %p807_p6, %p801_p3 }
  0x13   :  { %811 = shalt.err (!%p808_p7)
}
  0x14   :  { %39 = dma.hbm_to_vmem [thread:$0]  %s1125_s1, 128, %s37_s10, [#allocation6]  }
  0x15   :  { %s812_s25 = scalar_lea.hbm %s1127_s3, 4096 }
  0x16   :  { %p813_p8 = scmp.ne.s32.totalorder %s1127_s3, %s812_s25  ;;  %p816_p9 = scmp.lt.u32.totalorder %s812_s25, %s1127_s3 }
  0x18   :  { %p818_p10 = pnand %p816_p9, %p813_p8 }
  0x1a   :  { %821 = shalt.err (!%p818_p10)
}
  0x1b   :  { %s822_s30 = scalar_lea.vmem %s1014_s12, 4096  ;;  %p827_p12 = scmp.lt.s32.totalorder %s1014_s12, %s1014_s12 }
  0x1c   :  { %p823_p11 = scmp.ne.s32.totalorder %s1014_s12, %s822_s30  ;;  %p828_p13 = scmp.lt.s32.totalorder %s822_s30, %s822_s30 }
  0x1e   :  { %p829_p0 = por %p828_p13, %p827_p12 }
  0x20   :  { %p830_p1 = pnand %p829_p0, %p823_p11 }
  0x22   :  { %833 = shalt.err (!%p830_p1)
}
  0x23   :  { %s956_s1 = smov 512   ;;  %s957_s10 = smov 32  }
  0x24   :  { %61 = dma.hbm_to_vmem [thread:$0]  %s1127_s3, 4096, %s1014_s12, [#allocation9], %s956_s1, %s956_s1, %s957_s10  }
  0x25   :  { %s958_s14 = smov [#allocation2]   ;;  %s959_s16 = smov [#allocation7]  }
  0x26   :  { %s26_s15 = sshll.u32 %s958_s14, 4  ;;  %s46_s17 = sshll.u32 %s959_s16, 4  ;;  %s27_s15 = int_to_ptr.vmem [resolvable:$true] %s26_s15  ;;  %s47_s17 = int_to_ptr.vmem [resolvable:$true] %s46_s17 }
  0x27   :  { %s834_s20 = scalar_lea.hbm %s1124_s0, 128 }
  0x28   :  { %p835_p2 = scmp.ne.s32.totalorder %s1124_s0, %s834_s20  ;;  %p838_p3 = scmp.lt.u32.totalorder %s834_s20, %s1124_s0 }
  0x2a   :  { %p840_p4 = pnand %p838_p3, %p835_p2 }
  0x2c   :  { %843 = shalt.err (!%p840_p4)
}
  0x2d   :  { %s844_s3 = scalar_lea.vmem %s27_s15, 128  ;;  %p849_p6 = scmp.lt.s32.totalorder %s27_s15, %s27_s15 }
  0x2e   :  { %p845_p5 = scmp.ne.s32.totalorder %s27_s15, %s844_s3  ;;  %p850_p7 = scmp.lt.s32.totalorder %s844_s3, %s844_s3 }
  0x30   :  { %p851_p8 = por %p850_p7, %p849_p6 }
  0x32   :  { %p852_p9 = pnand %p851_p8, %p845_p5 }
  0x34   :  { %855 = shalt.err (!%p852_p9)
}
  0x35   :  { %29 = dma.hbm_to_vmem [thread:$0]  %s1124_s0, 128, %s27_s15, [#allocation3]  }
  0x36   :  { %s856_s28 = scalar_lea.hbm %s1126_s2, 128 }
  0x37   :  { %p857_p10 = scmp.ne.s32.totalorder %s1126_s2, %s856_s28  ;;  %p860_p11 = scmp.lt.u32.totalorder %s856_s28, %s1126_s2 }
  0x39   :  { %p862_p12 = pnand %p860_p11, %p857_p10 }
  0x3b   :  { %865 = shalt.err (!%p862_p12)
}
  0x3c   :  { %s866_s14 = scalar_lea.vmem %s47_s17, 128  ;;  %p871_p0 = scmp.lt.s32.totalorder %s47_s17, %s47_s17 }
  0x3d   :  { %p867_p13 = scmp.ne.s32.totalorder %s47_s17, %s866_s14  ;;  %p872_p1 = scmp.lt.s32.totalorder %s866_s14, %s866_s14 }
  0x3f   :  { %p873_p2 = por %p872_p1, %p871_p0 }
  0x41   :  { %p874_p3 = pnand %p873_p2, %p867_p13 }
  0x43   :  { %877 = shalt.err (!%p874_p3)
}
  0x44   :  { %49 = dma.hbm_to_vmem [thread:$0]  %s1126_s2, 128, %s47_s17, [#allocation6]  }
  0x45   :  { %s960_s16 = smov [#allocation10]   ;;  %s878_s21 = scalar_lea.hbm %s1128_s4, 8192 }
  0x46   :  { %s67_s18 = sshll.u32 %s960_s16, 4  ;;  %p879_p4 = scmp.ne.s32.totalorder %s1128_s4, %s878_s21  ;;  %s68_s18 = int_to_ptr.vmem [resolvable:$true] %s67_s18 }
  0x47   :  { %p882_p5 = scmp.lt.u32.totalorder %s878_s21, %s1128_s4 }
  0x49   :  { %p884_p6 = pnand %p882_p5, %p879_p4 }
  0x4b   :  { %887 = shalt.err (!%p884_p6)
}
  0x4c   :  { %s888_s12 = scalar_lea.vmem %s68_s18, 8192  ;;  %p893_p8 = scmp.lt.s32.totalorder %s68_s18, %s68_s18 }
  0x4d   :  { %p889_p7 = scmp.ne.s32.totalorder %s68_s18, %s888_s12  ;;  %p894_p9 = scmp.lt.s32.totalorder %s888_s12, %s888_s12 }
  0x4f   :  { %p895_p10 = por %p894_p9, %p893_p8 }
  0x51   :  { %p896_p11 = pnand %p895_p10, %p889_p7 }
  0x53   :  { %899 = shalt.err (!%p896_p11)
}
  0x54   :  { %73 = dma.hbm_to_vmem [thread:$0]  %s1128_s4, 8192, %s68_s18, [#allocation9], %s956_s1, %s956_s1, %s957_s10  }
  0x55   :  { %944 = dma.done.wait [#allocation3], 128  }
  0x56   :  { %945 = vsyncadd [#allocation3], 4294967168 }
  0x57   :  { %946 = dma.done.wait [#allocation6], 256  }
  0x58   :  { %947 = vsyncadd [#allocation6], 4294967040 }
  0x59   :  { %948 = dma.done.wait [#allocation9], 12288  }
  0x5a   :  { %949 = vsyncadd [#allocation9], 4294955008  ;;  %v961_v0 = vmov 0.0   ;;  %v130_v1 = vld [vmem:[#allocation10 + $0x8] sm:$0xff]  ;;  %v132_v3 = vld [vmem:[#allocation10 + $0x18] sm:$0xff]  ;;  %vm335_vm0 = vcmask 523264  }
  0x5b   :  { %257 = vmatprep.mubr.f32.mxu0 %v961_v0  ;;  %328 = vmatprep.mubr.f32.mxu1 %v961_v0  ;;  %v134_v2 = vld [vmem:[#allocation10 + $0x28] sm:$0xff]  ;;  %v136_v5 = vld [vmem:[#allocation10 + $0x38] sm:$0xff]  ;;  %v129_v6 = vld [vmem:[#allocation10] sm:$0xff] }
  0x5c   :  { %v668_v4 = vpack.c.bf16 %v134_v2, %v130_v1  ;;  %v133_v7 = vld [vmem:[#allocation10 + $0x20] sm:$0xff]  ;;  %v700_v8 = vpack.c.bf16 %v136_v5, %v132_v3  ;;  %v131_v10 = vld [vmem:[#allocation10 + $0x10] sm:$0xff]  ;;  %v138_v12 = vld [vmem:[#allocation10 + $0x48] sm:$0xff] }
  0x5d   :  { %v670_v9 = vpack.c.bf16 %v133_v7, %v129_v6  ;;  %v135_v11 = vld [vmem:[#allocation10 + $0x30] sm:$0xff]  ;;  %v142_v14 = vld [vmem:[#allocation10 + $0x68] sm:$0xff]  ;;  %v140_v15 = vld [vmem:[#allocation10 + $0x58] sm:$0xff] }
  0x5e   :  { %669 = vmatprep.subr.bf16.mxu0 %v668_v4  ;;  %v702_v13 = vpack.c.bf16 %v135_v11, %v131_v10  ;;  %v144_v16 = vld [vmem:[#allocation10 + $0x78] sm:$0xff]  ;;  %701 = vmatprep.subr.bf16.mxu1 %v700_v8  ;;  %v672_v17 = vpack.c.bf16 %v142_v14, %v138_v12  ;;  %v137_v19 = vld [vmem:[#allocation10 + $0x40] sm:$0xff]  ;;  %v139_v21 = vld [vmem:[#allocation10 + $0x50] sm:$0xff] }
  0x5f   :  { %671 = vmatpush1.bf16.msra.mxu0 %v670_v9  ;;  %v704_v18 = vpack.c.bf16 %v144_v16, %v140_v15  ;;  %v141_v20 = vld [vmem:[#allocation10 + $0x60] sm:$0xff]  ;;  %v143_v23 = vld [vmem:[#allocation10 + $0x70] sm:$0xff]  ;;  %v146_v24 = vld [vmem:[#allocation10 + $0x88] sm:$0xff] }
  0x60   :  { %703 = vmatpush1.bf16.msra.mxu1 %v702_v13  ;;  %v674_v22 = vpack.c.bf16 %v141_v20, %v137_v19  ;;  %v150_v25 = vld [vmem:[#allocation10 + $0xa8] sm:$0xff]  ;;  %673 = vmatprep.subr.bf16.mxu0 %v672_v17  ;;  %v706_v26 = vpack.c.bf16 %v143_v23, %v139_v21  ;;  %v148_v28 = vld [vmem:[#allocation10 + $0x98] sm:$0xff]  ;;  %v145_v30 = vld [vmem:[#allocation10 + $0x80] sm:$0xff] }
  0x61   :  { %705 = vmatprep.subr.bf16.mxu1 %v704_v18  ;;  %v676_v27 = vpack.c.bf16 %v150_v25, %v146_v24  ;;  %v152_v29 = vld [vmem:[#allocation10 + $0xb8] sm:$0xff]  ;;  %v149_v32 = vld [vmem:[#allocation10 + $0xa0] sm:$0xff]  ;;  %v147_v33 = vld [vmem:[#allocation10 + $0x90] sm:$0xff] }
  0x62   :  { %v708_v31 = vpack.c.bf16 %v152_v29, %v148_v28  ;;  %v151_v34 = vld [vmem:[#allocation10 + $0xb0] sm:$0xff]  ;;  %v678_v35 = vpack.c.bf16 %v149_v32, %v145_v30  ;;  %v154_v36 = vld [vmem:[#allocation10 + $0xc8] sm:$0xff]  ;;  %v156_v38 = vld [vmem:[#allocation10 + $0xd8] sm:$0xff] }
  0x63   :  { %675 = vmatpush1.bf16.msra.mxu0 %v674_v22  ;;  %v158_v37 = vld [vmem:[#allocation10 + $0xe8] sm:$0xff]  ;;  %v710_v39 = vpack.c.bf16 %v151_v34, %v147_v33  ;;  %v160_v41 = vld [vmem:[#allocation10 + $0xf8] sm:$0xff]  ;;  %v153_v42 = vld [vmem:[#allocation10 + $0xc0] sm:$0xff] }
  0x64   :  { %707 = vmatpush1.bf16.msra.mxu1 %v706_v26  ;;  %677 = vmatprep.subr.bf16.mxu0 %v676_v27  ;;  %v680_v40 = vpack.c.bf16 %v158_v37, %v154_v36  ;;  %v157_v43 = vld [vmem:[#allocation10 + $0xe0] sm:$0xff]  ;;  %v712_v44 = vpack.c.bf16 %v160_v41, %v156_v38  ;;  %v155_v45 = vld [vmem:[#allocation10 + $0xd0] sm:$0xff]  ;;  %v162_v47 = vld [vmem:[#allocation10 + $0x108] sm:$0xff] }
  0x65   :  { %709 = vmatprep.subr.bf16.mxu1 %v708_v31  ;;  %v159_v46 = vld [vmem:[#allocation10 + $0xf0] sm:$0xff]  ;;  %v166_v48 = vld [vmem:[#allocation10 + $0x128] sm:$0xff]  ;;  %v164_v49 = vld [vmem:[#allocation10 + $0x118] sm:$0xff]  ;;  %v682_v51 = vpack.c.bf16 %v157_v43, %v153_v42 }
  0x66   :  { %v168_v50 = vld [vmem:[#allocation10 + $0x138] sm:$0xff]  ;;  %v714_v52 = vpack.c.bf16 %v159_v46, %v155_v45  ;;  %v684_v53 = vpack.c.bf16 %v166_v48, %v162_v47  ;;  %v161_v54 = vld [vmem:[#allocation10 + $0x100] sm:$0xff]  ;;  %v163_v56 = vld [vmem:[#allocation10 + $0x110] sm:$0xff] }
  0x67   :  { %679 = vmatpush1.bf16.msra.mxu0 %v678_v35  ;;  %v165_v55 = vld [vmem:[#allocation10 + $0x120] sm:$0xff]  ;;  %v716_v57 = vpack.c.bf16 %v168_v50, %v164_v49  ;;  %v167_v58 = vld [vmem:[#allocation10 + $0x130] sm:$0xff]  ;;  %v170_v59 = vld [vmem:[#allocation10 + $0x148] sm:$0xff] }
  0x68   :  { %711 = vmatpush1.bf16.msra.mxu1 %v710_v39  ;;  %681 = vmatprep.subr.bf16.mxu0 %v680_v40  ;;  %v174_v60 = vld [vmem:[#allocation10 + $0x168] sm:$0xff]  ;;  %v172_v61 = vld [vmem:[#allocation10 + $0x158] sm:$0xff]  ;;  %v686_v63 = vpack.c.bf16 %v165_v55, %v161_v54  ;;  %v718_v1 = vpack.c.bf16 %v167_v58, %v163_v56  ;;  %v169_v3 = vld [vmem:[#allocation10 + $0x140] sm:$0xff] }
  0x69   :  { %713 = vmatprep.subr.bf16.mxu1 %v712_v44  ;;  %v176_v62 = vld [vmem:[#allocation10 + $0x178] sm:$0xff]  ;;  %v688_v2 = vpack.c.bf16 %v174_v60, %v170_v59  ;;  %v173_v4 = vld [vmem:[#allocation10 + $0x160] sm:$0xff]  ;;  %v171_v5 = vld [vmem:[#allocation10 + $0x150] sm:$0xff] }
  0x6a   :  { %v720_v6 = vpack.c.bf16 %v176_v62, %v172_v61  ;;  %v175_v7 = vld [vmem:[#allocation10 + $0x170] sm:$0xff]  ;;  %v178_v8 = vld [vmem:[#allocation10 + $0x188] sm:$0xff]  ;;  %v180_v10 = vld [vmem:[#allocation10 + $0x198] sm:$0xff]  ;;  %v690_v12 = vpack.c.bf16 %v173_v4, %v169_v3 }
  0x6b   :  { %683 = vmatpush1.bf16.msra.mxu0 %v682_v51  ;;  %v182_v9 = vld [vmem:[#allocation10 + $0x1a8] sm:$0xff]  ;;  %v184_v11 = vld [vmem:[#allocation10 + $0x1b8] sm:$0xff]  ;;  %v722_v13 = vpack.c.bf16 %v175_v7, %v171_v5  ;;  %v177_v15 = vld [vmem:[#allocation10 + $0x180] sm:$0xff] }
  0x6c   :  { %715 = vmatpush1.bf16.msra.mxu1 %v714_v52  ;;  %685 = vmatprep.subr.bf16.mxu0 %v684_v53  ;;  %v692_v14 = vpack.c.bf16 %v182_v9, %v178_v8  ;;  %v181_v16 = vld [vmem:[#allocation10 + $0x1a0] sm:$0xff]  ;;  %v179_v17 = vld [vmem:[#allocation10 + $0x190] sm:$0xff]  ;;  %v724_v18 = vpack.c.bf16 %v184_v11, %v180_v10  ;;  %v186_v20 = vld [vmem:[#allocation10 + $0x1c8] sm:$0xff] }
  0x6d   :  { %717 = vmatprep.subr.bf16.mxu1 %v716_v57  ;;  %v183_v19 = vld [vmem:[#allocation10 + $0x1b0] sm:$0xff]  ;;  %v190_v21 = vld [vmem:[#allocation10 + $0x1e8] sm:$0xff]  ;;  %v188_v22 = vld [vmem:[#allocation10 + $0x1d8] sm:$0xff]  ;;  %v694_v24 = vpack.c.bf16 %v181_v16, %v177_v15 }
  0x6e   :  { %v192_v23 = vld [vmem:[#allocation10 + $0x1f8] sm:$0xff]  ;;  %v726_v25 = vpack.c.bf16 %v183_v19, %v179_v17  ;;  %v696_v26 = vpack.c.bf16 %v190_v21, %v186_v20  ;;  %v185_v27 = vld [vmem:[#allocation10 + $0x1c0] sm:$0xff]  ;;  %v187_v29 = vld [vmem:[#allocation10 + $0x1d0] sm:$0xff]  ;;  %v483_v20 = vlaneseq }
  0x6f   :  { %687 = vmatpush1.bf16.msra.mxu0 %v686_v63  ;;  %v189_v28 = vld [vmem:[#allocation10 + $0x1e0] sm:$0xff]  ;;  %v728_v30 = vpack.c.bf16 %v192_v23, %v188_v22  ;;  %v191_v31 = vld [vmem:[#allocation10 + $0x1f0] sm:$0xff]  ;;  %v97_v32 = vld [vmem:[#allocation8 + $0x8] sm:$0xff] }
  0x70   :  { %719 = vmatpush1.bf16.msra.mxu1 %v718_v1  ;;  %689 = vmatprep.subr.bf16.mxu0 %v688_v2  ;;  %v101_v33 = vld [vmem:[#allocation8 + $0x28] sm:$0xff]  ;;  %v99_v34 = vld [vmem:[#allocation8 + $0x18] sm:$0xff]  ;;  %v698_v36 = vpack.c.bf16 %v189_v28, %v185_v27  ;;  %v730_v37 = vpack.c.bf16 %v191_v31, %v187_v29  ;;  %v96_v39 = vld [vmem:[#allocation8] sm:$0xff]  ;;  %v484_v21 = vshrl.u32 %v483_v20, 7 }
  0x71   :  { %721 = vmatprep.subr.bf16.mxu1 %v720_v6  ;;  %v103_v35 = vld [vmem:[#allocation8 + $0x38] sm:$0xff]  ;;  %v732_v38 = vpack.c.bf16 %v101_v33, %v97_v32  ;;  %v100_v40 = vld [vmem:[#allocation8 + $0x20] sm:$0xff]  ;;  %v98_v41 = vld [vmem:[#allocation8 + $0x10] sm:$0xff] }
  0x72   :  { %v748_v42 = vpack.c.bf16 %v103_v35, %v99_v34  ;;  %v102_v43 = vld [vmem:[#allocation8 + $0x30] sm:$0xff]  ;;  %v105_v44 = vld [vmem:[#allocation8 + $0x48] sm:$0xff]  ;;  %v107_v46 = vld [vmem:[#allocation8 + $0x58] sm:$0xff]  ;;  %v734_v49 = vpack.c.bf16 %v100_v40, %v96_v39  ;;  %v485_v22 = vsub.s32 0, %v484_v21  ;;  %v497_v28 = vsub.s32 3, %v484_v21 }
  0x73   :  { %691 = vmatpush1.bf16.msra.mxu0 %v690_v12  ;;  %v109_v45 = vld [vmem:[#allocation8 + $0x68] sm:$0xff]  ;;  %v111_v47 = vld [vmem:[#allocation8 + $0x78] sm:$0xff]  ;;  %v128_v48 = vld [vmem:[#allocation5] sm:$0xff]  ;;  %v750_v50 = vpack.c.bf16 %v102_v43, %v98_v41 }
  0x74   :  { %723 = vmatpush1.bf16.msra.mxu1 %v722_v13  ;;  %693 = vmatprep.subr.bf16.mxu0 %v692_v14  ;;  %v736_v51 = vpack.c.bf16 %v109_v45, %v105_v44  ;;  %v104_v52 = vld [vmem:[#allocation8 + $0x40] sm:$0xff]  ;;  %v106_v54 = vld [vmem:[#allocation8 + $0x50] sm:$0xff]  ;;  %v752_v55 = vpack.c.bf16 %v111_v47, %v107_v46  ;;  %v113_v57 = vld [vmem:[#allocation8 + $0x88] sm:$0xff] }
  0x75   :  { %725 = vmatprep.subr.bf16.mxu1 %v724_v18  ;;  %v108_v53 = vld [vmem:[#allocation8 + $0x60] sm:$0xff]  ;;  %v110_v56 = vld [vmem:[#allocation8 + $0x70] sm:$0xff]  ;;  %v117_v58 = vld [vmem:[#allocation8 + $0xa8] sm:$0xff] }
  0x76   :  { %v115_v59 = vld [vmem:[#allocation8 + $0x98] sm:$0xff]  ;;  %v738_v61 = vpack.c.bf16 %v108_v53, %v104_v52  ;;  %v754_v62 = vpack.c.bf16 %v110_v56, %v106_v54  ;;  %v740_v63 = vpack.c.bf16 %v117_v58, %v113_v57  ;;  %v112_v1 = vld [vmem:[#allocation8 + $0x80] sm:$0xff]  ;;  %v114_v3 = vld [vmem:[#allocation8 + $0x90] sm:$0xff] }
  0x77   :  { %695 = vmatpush1.bf16.msra.mxu0 %v694_v24  ;;  %v119_v60 = vld [vmem:[#allocation8 + $0xb8] sm:$0xff]  ;;  %v116_v2 = vld [vmem:[#allocation8 + $0xa0] sm:$0xff]  ;;  %v118_v5 = vld [vmem:[#allocation8 + $0xb0] sm:$0xff]  ;;  %v489_v24 = vsub.s32 1, %v484_v21 }
  0x78   :  { %727 = vmatpush1.bf16.msra.mxu1 %v726_v25  ;;  %697 = vmatprep.subr.bf16.mxu0 %v696_v26  ;;  %v756_v4 = vpack.c.bf16 %v119_v60, %v115_v59  ;;  %v121_v6 = vld [vmem:[#allocation8 + $0xc8] sm:$0xff]  ;;  %v123_v8 = vld [vmem:[#allocation8 + $0xd8] sm:$0xff]  ;;  %v742_v10 = vpack.c.bf16 %v116_v2, %v112_v1  ;;  %v758_v11 = vpack.c.bf16 %v118_v5, %v114_v3  ;;  %v120_v13 = vld [vmem:[#allocation8 + $0xc0] sm:$0xff]  ;;  %v493_v25 = vsub.s32 2, %v484_v21 }
  0x79   :  { %729 = vmatprep.subr.bf16.mxu1 %v728_v30  ;;  %v125_v7 = vld [vmem:[#allocation8 + $0xe8] sm:$0xff]  ;;  %v127_v9 = vld [vmem:[#allocation8 + $0xf8] sm:$0xff]  ;;  %v124_v14 = vld [vmem:[#allocation8 + $0xe0] sm:$0xff] }
  0x7a   :  { %v744_v12 = vpack.c.bf16 %v125_v7, %v121_v6  ;;  %v760_v15 = vpack.c.bf16 %v127_v9, %v123_v8  ;;  %v122_v16 = vld [vmem:[#allocation8 + $0xd0] sm:$0xff]  ;;  %v746_v18 = vpack.c.bf16 %v124_v14, %v120_v13  ;;  %v481_v23 = vld [vmem:[%s1129_s5] sm:$0xf] }
  0x7b   :  { %699 = vmatpush1.bf16.msra.mxu0 %v698_v36  ;;  %v126_v17 = vld [vmem:[#allocation8 + $0xf0] sm:$0xff]  ;;  %v486_v26 = vrot.slane %v481_v23, %v485_v22  ;;  %v490_v27 = vrot.slane %v481_v23, %v489_v24  ;;  %v494_v30 = vrot.slane %v481_v23, %v493_v25  ;;  %v498_v36 = vrot.slane %v481_v23, %v497_v28  ;;  %v508_v58 = vld [vmem:[%s1130_s6] sm:$0xf]  ;;  %s962_s6 = smov [#allocation12]  }
  0x7c   :  { %731 = vmatpush1.bf16.msra.mxu1 %v730_v37  ;;  %733 = vmatprep.subr.bf16.mxu0 %v732_v38  ;;  %v762_v19 = vpack.c.bf16 %v126_v17, %v122_v16  ;;  %v509_v59 = vld [vmem:[%s1131_s7] sm:$0xf]  ;;  %v541_v60 = vrot.slane %v508_v58, %v485_v22  ;;  %v549_v1 = vrot.slane %v508_v58, %v493_v25  ;;  %s651_s7 = sshll.u32 %s962_s6, 4  ;;  %s652_s7 = int_to_ptr.vmem [resolvable:$true] %s651_s7 }
  0x7d   :  { %749 = vmatprep.subr.bf16.mxu1 %v748_v42  ;;  %v570_v2 = vrot.slane %v509_v59, %v489_v24  ;;  %v574_v8 = vrot.slane %v509_v59, %v493_v25  ;;  %v553_v9 = vrot.slane %v508_v58, %v497_v28  ;;  %v578_v16 = vrot.slane %v509_v59, %v497_v28  ;;  %s900_s27 = scalar_lea.vmem %s652_s7, 128  ;;  %p905_p13 = scmp.lt.s32.totalorder %s652_s7, %s652_s7 }
  0x7e   :  { %258 = vmatmul.mubr.f32.vlgmr.msra.gmra.mrb[0].mxu0 %v128_v48  ;;  %p901_p12 = scmp.ne.s32.totalorder %s652_s7, %s900_s27  ;;  %p906_p0 = scmp.lt.s32.totalorder %s900_s27, %s900_s27 }
  0x7f   :  { %329 = vmatmul.mubr.f32.vlgmr.msra.gmra.mrb[0].mxu1 %v128_v48  ;;  %735 = vmatpush1.bf16.msra.mxu0 %v734_v49 }
  0x80   :  { %751 = vmatpush1.bf16.msra.mxu1 %v750_v50  ;;  %737 = vmatprep.subr.bf16.mxu0 %v736_v51  ;;  %p907_p1 = por %p906_p0, %p905_p13 }
  0x81   :  { %753 = vmatprep.subr.bf16.mxu1 %v752_v55  ;;  %403 = vmatprep.mubr.f32.mxu0 %v961_v0 }
  0x82   :  { %474 = vmatprep.mubr.f32.mxu1 %v961_v0  ;;  %v95_v0 = vld [vmem:[#allocation2] sm:$0xff]  ;;  %p908_p2 = pnand %p907_p1, %p901_p12 }
  0x83   :  { %739 = vmatpush1.bf16.msra.mxu0 %v738_v61  ;;  %v545_v61 = vrot.slane %v508_v58, %v489_v24  ;;  %v507_v24 = vld [vmem:[#allocation7] sm:$0xff] }
  0x84   :  { %755 = vmatpush1.bf16.msra.mxu1 %v754_v62  ;;  %741 = vmatprep.subr.bf16.mxu0 %v740_v63  ;;  %v566_v63 = vrot.slane %v509_v59, %v485_v22 }
  0x85   :  { %757 = vmatprep.subr.bf16.mxu1 %v756_v4 }
  0x87   :  { %743 = vmatpush1.bf16.msra.mxu0 %v742_v10 }
  0x88   :  { %759 = vmatpush1.bf16.msra.mxu1 %v758_v11  ;;  %745 = vmatprep.subr.bf16.mxu0 %v744_v12 }
  0x89   :  { %761 = vmatprep.subr.bf16.mxu1 %v760_v15 }
  0x8b   :  { %747 = vmatpush1.bf16.msra.mxu0 %v746_v18 }
  0x8c   :  { %763 = vmatpush1.bf16.msra.mxu1 %v762_v19 }
  0x8e   :  { %666 = vmatmul.mubr.msk.f32.vlgmr.msra.gmra.mrb[0].mxu0 %vm335_vm0, %v95_v0 }
  0x8f   :  { %667 = vmatmul.mubr.msk.f32.vlgmr.msra.gmra.mrb[0].mxu1 %vm335_vm0, %v95_v0 }
 0x161   :  { %v405_v29 = vpop.f32.mrb[0].mxu0 }
 0x162   :  { %v503_v31 = vadd.f32 %v486_v26, %v405_v29  ;;  %v476_v32 = vpop.f32.mrb[0].mxu1  ;;  %v407_v33 = vpop.f32.mrb[1].mxu0 }
 0x163   :  { %v504_v34 = vadd.f32 %v490_v27, %v407_v33  ;;  %v478_v35 = vpop.f32.mrb[1].mxu1  ;;  %v505_v37 = vadd.f32 %v494_v30, %v476_v32 }
 0x164   :  { %v506_v39 = vadd.f32 %v498_v36, %v478_v35 }
 0x165   :  { %v510_v38 = vadd.f32 %v504_v34, %v503_v31 }
 0x167   :  { %v511_v40 = vadd.f32 %v510_v38, %v505_v37 }
 0x169   :  { %v512_v41 = vadd.f32 %v511_v40, %v506_v39 }
 0x16b   :  { %513 = vadd.xlane.f32.xlu0 %v512_v41 }
 0x1f8   :  { %v514_v42 = vpop.xlane.xlu0 %513 }
 0x1f9   :  { %v516_v43 = vmul.f32 0.001953125, %v514_v42 }
 0x1fb   :  { %v517_v44 = vsub.f32 %v503_v31, %v516_v43  ;;  %v518_v45 = vsub.f32 %v504_v34, %v516_v43  ;;  %v519_v46 = vsub.f32 %v505_v37, %v516_v43  ;;  %v520_v47 = vsub.f32 %v506_v39, %v516_v43 }
 0x1fd   :  { %v521_v48 = vmul.f32 %v517_v44, %v517_v44  ;;  %v522_v49 = vmul.f32 %v518_v45, %v518_v45  ;;  %v523_v50 = vmul.f32 %v519_v46, %v519_v46  ;;  %v524_v52 = vmul.f32 %v520_v47, %v520_v47 }
 0x1ff   :  { %v525_v51 = vadd.f32 %v522_v49, %v521_v48 }
 0x201   :  { %v526_v53 = vadd.f32 %v525_v51, %v523_v50 }
 0x203   :  { %v527_v54 = vadd.f32 %v526_v53, %v524_v52 }
 0x205   :  { %528 = vadd.xlane.f32.xlu0 %v527_v54 }
 0x292   :  { %v529_v55 = vpop.xlane.xlu0 %528 }
 0x293   :  { %v530_v56 = vmul.f32 0.001953125, %v529_v55 }
 0x295   :  { %v531_v57 = vadd.f32 1e-05, %v530_v56 }
 0x297   :  { %778 = vrsqrt.f32 %v531_v57 }
 0x2a1   :  { %v779_v62 = vpop.eup %778 }
 0x2a2   :  { %v533_v3 = vmul.f32 %v779_v62, %v517_v44  ;;  %v534_v4 = vmul.f32 %v779_v62, %v518_v45  ;;  %v535_v5 = vmul.f32 %v779_v62, %v519_v46  ;;  %v536_v10 = vmul.f32 %v779_v62, %v520_v47 }
 0x2a4   :  { %v558_v6 = vmul.f32 %v541_v60, %v533_v3  ;;  %v559_v7 = vmul.f32 %v545_v61, %v534_v4  ;;  %v560_v11 = vmul.f32 %v549_v1, %v535_v5  ;;  %v561_v17 = vmul.f32 %v553_v9, %v536_v10 }
 0x2a6   :  { %v583_v12 = vadd.f32 %v566_v63, %v558_v6  ;;  %v584_v13 = vadd.f32 %v570_v2, %v559_v7  ;;  %v585_v18 = vadd.f32 %v574_v8, %v560_v11  ;;  %v586_v19 = vadd.f32 %v578_v16, %v561_v17 }
 0x2a8   :  { %v604_v14 = vmul.f32 0.5, %v583_v12  ;;  %v605_v15 = vmul.f32 0.5, %v584_v13  ;;  %v607_v0 = vmul.f32 0.5, %v586_v19 }
 0x2aa   :  { %780 = vtanh.f32 %v604_v14 }
 0x2ab   :  { %782 = vtanh.f32 %v605_v15 }
 0x2ac   :  { %784 = vtanh.f32 %v585_v18 }
 0x2ad   :  { %786 = vtanh.f32 %v607_v0 }
 0x2b4   :  { %v781_v20 = vpop.eup %780 }
 0x2b5   :  { %v783_v21 = vpop.eup %782  ;;  %v616_v22 = vmul.f32 0.5, %v781_v20 }
 0x2b6   :  { %v617_v23 = vmul.f32 0.5, %v783_v21  ;;  %v785_v26 = vpop.eup %784 }
 0x2b7   :  { %v620_v25 = vadd.f32 0.5, %v616_v22 }
 0x2b8   :  { %v621_v27 = vadd.f32 0.5, %v617_v23 }
 0x2b9   :  { %v629_v29 = vmul.f32 %v785_v26, %v620_v25 }
 0x2ba   :  { %v628_v28 = vmul.f32 %v621_v27, %v507_v24 }
 0x2bc   :  { %v630_v30 = vadd.f32 %v629_v29, %v628_v28 }
 0x2be   :  { %788 = vtanh.f32 %v630_v30  ;;  %634 = vst [vmem:[#allocation12] sm:$0xff] %v630_v30 }
 0x2bf   :  { %911 = shalt.err (!%p908_p2)
}
 0x2c0   :  { %s912_s30 = scalar_lea.hbm %s1133_s9, 128 }
 0x2c1   :  { %p913_p3 = scmp.ne.s32.totalorder %s1133_s9, %s912_s30  ;;  %p916_p4 = scmp.lt.u32.totalorder %s912_s30, %s1133_s9 }
 0x2c3   :  { %p918_p5 = pnand %p916_p4, %p913_p3 }
 0x2c5   :  { %921 = shalt.err (!%p918_p5)
}
 0x2c6   :  { %654 = dma.vmem_to_hbm [thread:$0]  %s652_s7, 128, %s1133_s9, [#allocation13]   ;;  %v787_v31 = vpop.eup %786 }
 0x2c7   :  { %v619_v32 = vmul.f32 0.5, %v787_v31  ;;  %s963_s18 = smov [#allocation11]  }
 0x2c8   :  { %s641_s19 = sshll.u32 %s963_s18, 4  ;;  %v789_v34 = vpop.eup %788  ;;  %s642_s19 = int_to_ptr.vmem [resolvable:$true] %s641_s19 }
 0x2c9   :  { %v623_v33 = vadd.f32 0.5, %v619_v32  ;;  %s922_s20 = scalar_lea.vmem %s642_s19, 128  ;;  %p927_p7 = scmp.lt.s32.totalorder %s642_s19, %s642_s19 }
 0x2ca   :  { %p923_p6 = scmp.ne.s32.totalorder %s642_s19, %s922_s20  ;;  %p928_p8 = scmp.lt.s32.totalorder %s922_s20, %s922_s20 }
 0x2cb   :  { %v632_v35 = vmul.f32 %v789_v34, %v623_v33 }
 0x2cc   :  { %p929_p9 = por %p928_p8, %p927_p7 }
 0x2cd   :  { %633 = vst [vmem:[#allocation11] sm:$0xff] %v632_v35 }
 0x2ce   :  { %p930_p10 = pnand %p929_p9, %p923_p6 }
 0x2d0   :  { %933 = shalt.err (!%p930_p10)
}
 0x2d1   :  { %s934_s9 = scalar_lea.hbm %s1132_s8, 128 }
 0x2d2   :  { %p935_p11 = scmp.ne.s32.totalorder %s1132_s8, %s934_s9  ;;  %p938_p12 = scmp.lt.u32.totalorder %s934_s9, %s1132_s8 }
 0x2d4   :  { %p940_p13 = pnand %p938_p12, %p935_p11 }
 0x2d6   :  { %943 = shalt.err (!%p940_p13)
}
 0x2d7   :  { %644 = dma.vmem_to_hbm [thread:$0]  %s642_s19, 128, %s1132_s8, [#allocation4]  }
 0x2d8   :  { %950 = dma.done.wait [#allocation4], 128  }
 0x2d9   :  { %951 = vsyncadd [#allocation4], 4294967168 }
 0x2da   :  { %952 = dma.done.wait [#allocation13], 128  }
 0x2db   :  { %953 = vsyncadd [#allocation13], 4294967168 }
 0x2dc   :  { %661 = vsyncpa [#allocation3], 1 }
 0x2dd   :  { %662 = vsyncpa [#allocation6], 1 }
 0x2de   :  { %663 = vsyncpa [#allocation9], 1 }
 0x2df   :  { %664 = vsyncpa [#allocation4], 1 }
 0x2e0   :  { %665 = vsyncpa [#allocation13], 1 }

</bundles_post_ra>
